<compile_context>
chip_gen: v6e
topology: v6e:2x2x1
jax: 0.10.0
libtpu: 0.0.40
codegen_flags: <defaults>
</compile_context>

<pallas_src>
import numpy as np
import jax
import jax.numpy as jnp
from jax.experimental import pallas as pl
from jax.experimental.pallas import tpu as pltpu


# ----------------------------------------------------------------------------------
# Kernel: one (batch, row-tile) step over lane-dense packed features.
# ----------------------------------------------------------------------------------
def aff_kernel(x_ref, r_ref, xg_ref, w1_ref, b1_ref, w2_ref, b2_ref, o_ref):
    x = x_ref[0]                  # [TR, 128]   G points x C channels per row
    r = r_ref[0]                  # [TR, 128]
    xa = x + r

    # local attention branch: per-point MLP via block-diagonalized weights (exact)
    h = jnp.dot(xa, w1_ref[...], preferred_element_type=jnp.float32) + b1_ref[...]
    h = jnp.maximum(h, 0.0)
    xl = jnp.dot(h, w2_ref[...], preferred_element_type=jnp.float32) + b2_ref[...]

    # global branch result (precomputed per batch, tiled G x along lanes)
    z = xl + xg_ref[0]            # [TR, 128] + [1, 128]
    w = jax.nn.sigmoid(z)         # exp on EUP; no explicit f32 divide on the VALU

    # 2*x*w + 2*r*(1-w) == 2*(r + (x - r)*w); padded rows (x=r=0) give exactly 0
    o_ref[0] = (2.0 * (r + (x - r) * w)).astype(o_ref.dtype)


def aff_pallas_call(xd, rd, xg_t, w1_bd, b1_bd, w2_bd, b2_bd, *, row_tile):
    B, R, L = xd.shape                      # L == 128 (lane-dense)
    GM = w1_bd.shape[1]                     # G * mid_channels
    grid = (B, R // row_tile)

    feat_spec = pl.BlockSpec((1, row_tile, L), lambda b, t: (b, t, 0))
    xg_spec = pl.BlockSpec((1, 1, L), lambda b, t: (b, 0, 0))

    def const_spec(shape):
        return pl.BlockSpec(shape, lambda b, t: (0, 0))

    return pl.pallas_call(
        aff_kernel,
        out_shape=jax.ShapeDtypeStruct((B, R, L), jnp.float32),
        grid=grid,
        in_specs=[
            feat_spec, feat_spec, xg_spec,
            const_spec((L, GM)), const_spec((1, GM)),
            const_spec((GM, L)), const_spec((1, L)),
        ],
        out_specs=feat_spec,
        compiler_params=pltpu.CompilerParams(
            dimension_semantics=("parallel", "parallel")),
    )(xd, rd, xg_t, w1_bd, b1_bd, w2_bd, b2_bd)


# ----------------------------------------------------------------------------------
# Host-side glue: global branch in XLA, lane-dense repack, block-diag weights, scatter.
# ----------------------------------------------------------------------------------
def aff_forward(x_feats, res_feats, batch_ids_np, p):
    N, C = x_feats.shape
    assert 128 % C == 0, "lane packing assumes C divides 128"  # TODO(synk): pad C otherwise
    G = 128 // C
    B = int(batch_ids_np.max()) + 1
    counts = np.bincount(batch_ids_np, minlength=B)

    # ---- global attention branch (tiny, B x C): masked mean pool + MLP in plain XLA ----
    bid = jnp.asarray(batch_ids_np)
    xa_flat = x_feats + res_feats
    seg = jax.ops.segment_sum(xa_flat, bid, num_segments=B)                   # [B, C]
    pooled = seg / jnp.maximum(jnp.asarray(counts, jnp.float32), 1.0)[:, None]
    g = jnp.maximum(pooled @ p["w1g"] + p["b1g"], 0.0)
    xg = g @ p["w2g"] + p["b2g"]                                              # [B, C]
    xg_t = jnp.tile(xg, (1, G)).reshape(B, 1, G * C)                          # [B, 1, 128]

    # ---- lane-dense repack of per-batch point tiles (padded rows are all-zero) ----
    max_cnt = int(counts.max()) if counts.size else 0
    R = max(8, int(np.ceil(max(max_cnt, 1) / G / 8)) * 8)   # packed rows, multiple of 8
    row_tile = min(512, R)
    R = int(np.ceil(R / row_tile)) * row_tile
    Pmax = R * G

    idx = np.full((B, Pmax), N, dtype=np.int32)              # N = out-of-range sentinel
    for b in range(B):
        sel = np.nonzero(batch_ids_np == b)[0]
        idx[b, : sel.size] = sel

    xp = jnp.concatenate([x_feats, jnp.zeros((1, C), x_feats.dtype)], axis=0)
    rp = jnp.concatenate([res_feats, jnp.zeros((1, C), res_feats.dtype)], axis=0)
    xd = xp[idx].reshape(B, R, G * C)                         # [B, R, 128] lane-dense
    rd = rp[idx].reshape(B, R, G * C)

    # ---- block-diagonalized local-branch weights (8 copies -> lane-dense matmuls) ----
    eye = jnp.eye(G, dtype=jnp.float32)
    w1_bd = jnp.kron(eye, p["w1l"])                           # [128, G*mid]
    b1_bd = jnp.tile(p["b1l"], (1, G))                        # [1, G*mid]
    w2_bd = jnp.kron(eye, p["w2l"])                           # [G*mid, 128]
    b2_bd = jnp.tile(p["b2l"], (1, G))                        # [1, 128]

    out_packed = aff_pallas_call(xd, rd, xg_t, w1_bd, b1_bd, w2_bd, b2_bd,
                                 row_tile=row_tile)

    # scatter padded batches back to the flat [N, C] output (output_feats)
    out_dense = out_packed.reshape(B * Pmax, C)
    out_flat = jnp.zeros((N, C), jnp.float32).at[idx.reshape(-1)].set(
        out_dense, mode="drop")
    return out_flat


def fold_linear_bn(W, b, gamma, beta, mean, var, eps=1e-5):
    """Fold Linear (y = xW + b) followed by eval-mode BatchNorm into W', b'."""
    scale = gamma / jnp.sqrt(var + eps)
    W_eff = W * scale[None, :]
    b_eff = b * scale + (beta - mean * scale)
    return W_eff, b_eff.reshape(1, -1)


def ref_forward(x_feats, res_feats, batch_ids, p):
    """Pure numpy reference mirroring the PyTorch per-batch loop."""
    x = np.asarray(x_feats, np.float64)
    r = np.asarray(res_feats, np.float64)
    out = np.zeros_like(x)
    for b in range(int(batch_ids.max()) + 1):
        sel = np.nonzero(batch_ids == b)[0]
        if sel.size == 0:
            continue
        xb, rb = x[sel], r[sel]
        xa = xb + rb
        h = np.maximum(xa @ np.asarray(p["w1l"]) + np.asarray(p["b1l"]), 0.0)
        xl = h @ np.asarray(p["w2l"]) + np.asarray(p["b2l"])
        pooled = xa.mean(axis=0, keepdims=True)               # AdaptiveAvgPool1d(1)
        g = np.maximum(pooled @ np.asarray(p["w1g"]) + np.asarray(p["b1g"]), 0.0)
        xg = g @ np.asarray(p["w2g"]) + np.asarray(p["b2g"])
        w = 1.0 / (1.0 + np.exp(-(xl + xg)))
        out[sel] = 2.0 * xb * w + 2.0 * rb * (1.0 - w)
    return out


if __name__ == "__main__":
    C = 16                    # in_channels == out_channels
    MID = C // 4
    N = 20                    # total number of points
    batch_ids = np.array([0] * 12 + [1] * 8, dtype=np.int32)   # x.indices[:, 0]

    key = jax.random.PRNGKey(0)
    ks = jax.random.split(key, 4)

    x_feats = jax.random.normal(ks[0], (N, C), jnp.float32)
    res_feats = jax.random.normal(ks[1], (N, C), jnp.float32)

    def make_branch(kbase):
        kk = jax.random.split(kbase, 12)
        W1 = jax.random.normal(kk[0], (C, MID), jnp.float32) * 0.2
        b1 = jax.random.normal(kk[1], (MID,), jnp.float32) * 0.1
        g1 = 1.0 + 0.1 * jax.random.normal(kk[2], (MID,), jnp.float32)
        be1 = 0.1 * jax.random.normal(kk[3], (MID,), jnp.float32)
        mu1 = 0.1 * jax.random.normal(kk[4], (MID,), jnp.float32)
        v1 = 1.0 + 0.1 * jnp.abs(jax.random.normal(kk[5], (MID,), jnp.float32))
        W2 = jax.random.normal(kk[6], (MID, C), jnp.float32) * 0.2
        b2 = jax.random.normal(kk[7], (C,), jnp.float32) * 0.1
        g2 = 1.0 + 0.1 * jax.random.normal(kk[8], (C,), jnp.float32)
        be2 = 0.1 * jax.random.normal(kk[9], (C,), jnp.float32)
        mu2 = 0.1 * jax.random.normal(kk[10], (C,), jnp.float32)
        v2 = 1.0 + 0.1 * jnp.abs(jax.random.normal(kk[11], (C,), jnp.float32))
        W1e, b1e = fold_linear_bn(W1, b1, g1, be1, mu1, v1)
        W2e, b2e = fold_linear_bn(W2, b2, g2, be2, mu2, v2)
        return W1e, b1e, W2e, b2e

    w1l, b1l, w2l, b2l = make_branch(ks[2])    # local_att (norm_fn)
    w1g, b1g, w2g, b2g = make_branch(ks[3])    # global_att (Norm)

    params = dict(w1l=w1l, b1l=b1l, w2l=w2l, b2l=b2l,
                  w1g=w1g, b1g=b1g, w2g=w2g, b2g=b2g)

    out_flat = aff_forward(x_feats, res_feats, batch_ids, params)
    out_flat = jax.block_until_ready(out_flat)

    # ---- correctness check against a numpy reference of the PyTorch forward ----
    ref = ref_forward(x_feats, res_feats, batch_ids, params)
    assert np.allclose(np.asarray(out_flat), ref, atol=1e-4, rtol=1e-4), (
        np.max(np.abs(np.asarray(out_flat) - ref)))

    print("KERNEL_OK")
</pallas_src>

<mosaic_0001>
module attributes {stable_mosaic.version = 11 : i64} {
  func.func @aff_kernel(%arg0: i32, %arg1: i32, %arg2: memref<1x8x128xf32, #tpu.memory_space<vmem>>, %arg3: memref<1x8x128xf32, #tpu.memory_space<vmem>>, %arg4: memref<1x1x128xf32, #tpu.memory_space<vmem>>, %arg5: memref<128x32xf32, #tpu.memory_space<vmem>>, %arg6: memref<1x32xf32, #tpu.memory_space<vmem>>, %arg7: memref<32x128xf32, #tpu.memory_space<vmem>>, %arg8: memref<1x128xf32, #tpu.memory_space<vmem>>, %arg9: memref<1x8x128xf32, #tpu.memory_space<vmem>>) attributes {dimension_semantics = [#tpu.dimension_semantics<parallel>, #tpu.dimension_semantics<parallel>], iteration_bounds = array<i64: 2, 1>, scalar_prefetch = 0 : i64, scratch_operands = 0 : i64, tpu.core_type = #tpu.core_type<tc>, window_params = [{transform_indices = @transform_0, window_bounds = array<i64: 1, 8, 128>}, {transform_indices = @transform_1, window_bounds = array<i64: 1, 8, 128>}, {transform_indices = @transform_2, window_bounds = array<i64: 1, 1, 128>}, {pipeline_mode = #tpu.pipeline_mode<synchronous>, transform_indices = @transform_3, window_bounds = array<i64: 128, 32>}, {pipeline_mode = #tpu.pipeline_mode<synchronous>, transform_indices = @transform_4, window_bounds = array<i64: 1, 32>}, {pipeline_mode = #tpu.pipeline_mode<synchronous>, transform_indices = @transform_5, window_bounds = array<i64: 32, 128>}, {pipeline_mode = #tpu.pipeline_mode<synchronous>, transform_indices = @transform_6, window_bounds = array<i64: 1, 128>}, {transform_indices = @transform_7, window_bounds = array<i64: 1, 8, 128>}]} {
    %c0 = arith.constant 0 : index
    %c0_0 = arith.constant 0 : index
    %c0_1 = arith.constant 0 : index
    %0 = vector.load %arg2[%c0, %c0_0, %c0_1] : memref<1x8x128xf32, #tpu.memory_space<vmem>>, vector<1x8x128xf32>
    %1 = vector.shape_cast %0 : vector<1x8x128xf32> to vector<8x128xf32>
    %c0_2 = arith.constant 0 : index
    %c0_3 = arith.constant 0 : index
    %c0_4 = arith.constant 0 : index
    %2 = vector.load %arg3[%c0_2, %c0_3, %c0_4] : memref<1x8x128xf32, #tpu.memory_space<vmem>>, vector<1x8x128xf32>
    %3 = vector.shape_cast %2 : vector<1x8x128xf32> to vector<8x128xf32>
    %4 = arith.addf %1, %3 : vector<8x128xf32>
    %c0_5 = arith.constant 0 : index
    %c0_6 = arith.constant 0 : index
    %5 = vector.load %arg5[%c0_5, %c0_6] : memref<128x32xf32, #tpu.memory_space<vmem>>, vector<128x32xf32>
    %cst = arith.constant dense<0.000000e+00> : vector<8x32xf32>
    %6 = tpu.matmul %4, %5, %cst {dimension_numbers = #tpu.dot_dimension_numbers<[1], [0], [0], [1], [0, 0, 1, 1], [], []>} : vector<8x128xf32>, vector<128x32xf32>, vector<8x32xf32> -> vector<8x32xf32>
    %c0_7 = arith.constant 0 : index
    %c0_8 = arith.constant 0 : index
    %7 = vector.load %arg6[%c0_7, %c0_8] : memref<1x32xf32, #tpu.memory_space<vmem>>, vector<1x32xf32>
    %8 = vector.broadcast %7 : vector<1x32xf32> to vector<8x32xf32>
    %9 = arith.addf %6, %8 : vector<8x32xf32>
    %cst_9 = arith.constant 0.000000e+00 : f32
    %10 = vector.broadcast %cst_9 : f32 to vector<8x32xf32>
    %11 = arith.maximumf %9, %10 : vector<8x32xf32>
    %c0_10 = arith.constant 0 : index
    %c0_11 = arith.constant 0 : index
    %12 = vector.load %arg7[%c0_10, %c0_11] : memref<32x128xf32, #tpu.memory_space<vmem>>, vector<32x128xf32>
    %cst_12 = arith.constant dense<0.000000e+00> : vector<8x128xf32>
    %13 = tpu.matmul %11, %12, %cst_12 {dimension_numbers = #tpu.dot_dimension_numbers<[1], [0], [0], [1], [0, 0, 1, 1], [], []>} : vector<8x32xf32>, vector<32x128xf32>, vector<8x128xf32> -> vector<8x128xf32>
    %c0_13 = arith.constant 0 : index
    %c0_14 = arith.constant 0 : index
    %14 = vector.load %arg8[%c0_13, %c0_14] : memref<1x128xf32, #tpu.memory_space<vmem>>, vector<1x128xf32>
    %15 = vector.broadcast %14 : vector<1x128xf32> to vector<8x128xf32>
    %16 = arith.addf %13, %15 : vector<8x128xf32>
    %c0_15 = arith.constant 0 : index
    %c0_16 = arith.constant 0 : index
    %c0_17 = arith.constant 0 : index
    %17 = vector.load %arg4[%c0_15, %c0_16, %c0_17] : memref<1x1x128xf32, #tpu.memory_space<vmem>>, vector<1x1x128xf32>
    %18 = vector.shape_cast %17 : vector<1x1x128xf32> to vector<1x128xf32>
    %19 = vector.broadcast %18 : vector<1x128xf32> to vector<8x128xf32>
    %20 = arith.addf %16, %19 : vector<8x128xf32>
    %21 = arith.negf %20 : vector<8x128xf32>
    %22 = math.exp %21 : vector<8x128xf32>
    %cst_18 = arith.constant 1.000000e+00 : f32
    %23 = vector.broadcast %cst_18 : f32 to vector<8x128xf32>
    %24 = arith.addf %23, %22 : vector<8x128xf32>
    %25 = arith.divf %23, %24 : vector<8x128xf32>
    %26 = arith.subf %1, %3 : vector<8x128xf32>
    %27 = arith.mulf %26, %25 : vector<8x128xf32>
    %28 = arith.addf %3, %27 : vector<8x128xf32>
    %cst_19 = arith.constant 2.000000e+00 : f32
    %29 = vector.broadcast %cst_19 : f32 to vector<8x128xf32>
    %30 = arith.mulf %29, %28 : vector<8x128xf32>
    %c0_20 = arith.constant 0 : index
    %c0_21 = arith.constant 0 : index
    %c0_22 = arith.constant 0 : index
    %31 = vector.load %arg9[%c0_20, %c0_21, %c0_22] : memref<1x8x128xf32, #tpu.memory_space<vmem>>, vector<1x8x128xf32>
    %32 = vector.shape_cast %31 : vector<1x8x128xf32> to vector<8x128xf32>
    %33 = vector.shape_cast %30 : vector<8x128xf32> to vector<1x8x128xf32>
    tpu.vector_store %arg9[%c0_20, %c0_21, %c0_22], %33 {strides = array<i32>} : memref<1x8x128xf32, #tpu.memory_space<vmem>>, vector<1x8x128xf32>,
    return
  }
  func.func @transform_0(%arg0: i32, %arg1: i32) -> (i32, i32, i32) {
    %c0_i32 = arith.constant 0 : i32
    %c0_i32_0 = arith.constant 0 : i32
    return %arg0, %arg1, %c0_i32 : i32, i32, i32
  }
  func.func @transform_1(%arg0: i32, %arg1: i32) -> (i32, i32, i32) {
    %c0_i32 = arith.constant 0 : i32
    %c0_i32_0 = arith.constant 0 : i32
    return %arg0, %arg1, %c0_i32 : i32, i32, i32
  }
  func.func @transform_2(%arg0: i32, %arg1: i32) -> (i32, i32, i32) {
    %c0_i32 = arith.constant 0 : i32
    %c0_i32_0 = arith.constant 0 : i32
    %c0_i32_1 = arith.constant 0 : i32
    return %arg0, %c0_i32, %c0_i32_0 : i32, i32, i32
  }
  func.func @transform_3(%arg0: i32, %arg1: i32) -> (i32, i32) {
    %c0_i32 = arith.constant 0 : i32
    %c0_i32_0 = arith.constant 0 : i32
    %c0_i32_1 = arith.constant 0 : i32
    return %c0_i32, %c0_i32_0 : i32, i32
  }
  func.func @transform_4(%arg0: i32, %arg1: i32) -> (i32, i32) {
    %c0_i32 = arith.constant 0 : i32
    %c0_i32_0 = arith.constant 0 : i32
    %c0_i32_1 = arith.constant 0 : i32
    return %c0_i32, %c0_i32_0 : i32, i32
  }
  func.func @transform_5(%arg0: i32, %arg1: i32) -> (i32, i32) {
    %c0_i32 = arith.constant 0 : i32
    %c0_i32_0 = arith.constant 0 : i32
    %c0_i32_1 = arith.constant 0 : i32
    return %c0_i32, %c0_i32_0 : i32, i32
  }
  func.func @transform_6(%arg0: i32, %arg1: i32) -> (i32, i32) {
    %c0_i32 = arith.constant 0 : i32
    %c0_i32_0 = arith.constant 0 : i32
    %c0_i32_1 = arith.constant 0 : i32
    return %c0_i32, %c0_i32_0 : i32, i32
  }
  func.func @transform_7(%arg0: i32, %arg1: i32) -> (i32, i32, i32) {
    %c0_i32 = arith.constant 0 : i32
    %c0_i32_0 = arith.constant 0 : i32
    return %arg0, %arg1, %c0_i32 : i32, i32, i32
  }
}

</mosaic_0001>

<bundles_post_ra>
// kernel: tpu_custom_call.1
= control target key start
LH: loop header
LB: loop body
LE: loop exit
PB: predicated region body
PF: predicated region fallthrough
CT: control target
= control target key end

     0   :  { %12 = vsyncpa [#allocation3], 0  ;;  %s1116_s0 = inlined_call_operand.vmem [shape: f32[2,8,128], index: 0, kind: input, shape index: {}]   ;;  %s1117_s1 = inlined_call_operand.vmem [shape: f32[2,8,128], index: 1, kind: input, shape index: {}]   ;;  %s1118_s2 = inlined_call_operand.vmem [shape: f32[2,1,128], index: 2, kind: input, shape index: {}]   ;;  %s1119_s3 = inlined_call_operand.vmem [shape: f32[128,32], index: 3, kind: input, shape index: {}]   ;;  %s1120_s4 = inlined_call_operand.vmem [shape: f32[1,32], index: 4, kind: input, shape index: {}]   ;;  %s1121_s5 = inlined_call_operand.vmem [shape: f32[32,128], index: 5, kind: input, shape index: {}]   ;;  %s1122_s6 = inlined_call_operand.vmem [shape: f32[1,128], index: 6, kind: input, shape index: {}]   ;;  %s1123_s7 = inlined_call_operand.hbm [shape: f32[2,8,128], index: 7, kind: output, shape index: {}]  }
   0x1   :  { %14 = vsyncpa [#allocation3 + $0x1], 0  ;;  %s919_s24 = smov 0   ;;  %s921_s25 = smov 0  }
   0x2   :  { %s923_s26 = smov 0   ;;  %s925_s27 = smov 0  }
   0x3   :  { %s927_s28 = smov 0   ;;  %s929_s29 = smov 0  }
   0x4 LB: > { %s652_s30 = sadd.s32 4294967295, %s874_s29   ;;  %s653_s8 = sadd.s32 4294967294, %s874_s29   ;;  %s874_s29 = sphi %s929_s29, %s20_s29   ;;  %s870_s28 = sphi %s927_s28, %s1130_s28   ;;  %s866_s27 = sphi %s925_s27, %s1129_s27   ;;  %s862_s26 = sphi %s923_s26, %s1128_s26   ;;  %s858_s25 = sphi %s921_s25, %s1127_s25   ;;  %s854_s24 = sphi %s919_s24, %s1126_s24  }
   0x5   : > { %s32_s9 = sadd.s32 1, %s870_s28  ;;  %s207_s10 = sadd.s32 1, %s862_s26 }
   0x6   : > { %p34_p0 = scmp.ge.s32.totalorder %s32_s9, 2  ;;  %p217_p1 = scmp.ne.s32.totalorder %s862_s26, %s858_s25 }
   0x7   : > { %p218_p2 = scmp.eq.s32.totalorder %s652_s30, 1  ;;  %p223_p3 = scmp.ne.s32.totalorder %s858_s25, %s854_s24 }
   0x8   : > { %s1132_s9 = smov (%p34_p0, %s32_s9), 0  ;;  %p224_p5 = scmp.eq.s32.totalorder %s653_s8, 1 }
   0x9   : > { %p959_p4 = por %p218_p2, %p217_p1  ;;  %s202_s12 = ssub.s32 %s870_s28, %s1132_s9 }
   0xa   : > { %p656_p6 = scmp.ge.s32.totalorder %s874_s29, 1  ;;  %p205_p7 = scmp.eq.s32.totalorder %s202_s12, 0 }
   0xb   : > { %p966_p8 = por %p224_p5, %p223_p3  ;;  %p280_p9 = scmp.lt.s32.totalorder %s874_s29, 3 }
   0xc   : > { %s972_s14 = scalar_select %p205_p7, %s862_s26, %s207_s10  }
   0xd   : > { %p281_p10 = pnand %p656_p6, %p280_p9 }
   0xe   : > { %p324_p11 = scmp.lt.s32.totalorder (!%p281_p10), %s866_s27, 1  ;;  %s321_s20 = sand.u32 (!%p281_p10), 1, %s858_s25  }
   0xf   : > { %284 = sbr.rel (%p281_p10) target bundleno = 498 (0x1f2), region = 48  ;;  %s543_s16 = scalar_lea.sflag (!%p281_p10), [#allocation3], %s321_s20 }
  0x14   : > { %v359_v0 = vld [vmem:[%s1119_s3 + $0x78] sm:$0xff]  ;;  %v876_v1 = vmov 0.0   ;;  %v358_v2 = vld [vmem:[%s1119_s3 + $0x70] sm:$0xff]  ;;  %vm877_vm0 = vmmov 0   ;;  %v357_v3 = vld [vmem:[%s1119_s3 + $0x68] sm:$0xff]  ;;  %s1018_s22 = scalar_select %p324_p11, %s866_s27, 1 }
  0x15   : > { %691 = vmatprep.subr.mxu0 %v876_v1  ;;  %723 = vmatprep.mubr.msk.f32.mxu0 %vm877_vm0, %v876_v1  ;;  %v356_v4 = vld [vmem:[%s1119_s3 + $0x60] sm:$0xff]  ;;  %v441_v5 = vld [vmem:[%s1121_s5 + $0x18] sm:$0xff]  ;;  %v354_v7 = vld [vmem:[%s1119_s3 + $0x50] sm:$0xff]  ;;  %vm449_vm1 = vcmask 261120  }
  0x16   : > { %692 = vmatpush3.msra.mxu0 %v359_v0  ;;  %726 = vmatprep.subr.mxu1 %v876_v1  ;;  %v355_v6 = vld [vmem:[%s1119_s3 + $0x58] sm:$0xff]  ;;  %v353_v8 = vld [vmem:[%s1119_s3 + $0x48] sm:$0xff]  ;;  %v352_v9 = vld [vmem:[%s1119_s3 + $0x40] sm:$0xff]  ;;  %s658_s12 = sshll.u32 %s1018_s22, 3 }
  0x17   : > { %693 = vmatprep.subr.mxu0 %v876_v1  ;;  %734 = vmatprep.mubr.msk.f32.mxu1 %vm877_vm0, %v876_v1  ;;  %v351_v10 = vld [vmem:[%s1119_s3 + $0x38] sm:$0xff]  ;;  %v350_v11 = vld [vmem:[%s1119_s3 + $0x30] sm:$0xff]  ;;  %v349_v12 = vld [vmem:[%s1119_s3 + $0x28] sm:$0xff]  ;;  %s330_s21 = scalar_lea.vmem %s1116_s0, %s658_s12  ;;  %s337_s8 = scalar_lea.vmem %s1117_s1, %s658_s12 }
  0x18   : > { %694 = vmatpush3.msra.mxu0 %v358_v2  ;;  %727 = vmatpush3.msra.mxu1 %v441_v5  ;;  %v348_v13 = vld [vmem:[%s1119_s3 + $0x20] sm:$0xff]  ;;  %v347_v14 = vld [vmem:[%s1119_s3 + $0x18] sm:$0xff]  ;;  %v346_v15 = vld [vmem:[%s1119_s3 + $0x10] sm:$0xff]  ;;  %s340_s12 = scalar_lea.vmem %s1118_s2, %s1018_s22  ;;  %s666_s22 = sshll.u32 %s866_s27, 7 }
  0x19   : > { %695 = vmatprep.subr.mxu0 %v876_v1  ;;  %728 = vmatprep.subr.mxu1 %v876_v1  ;;  %v341_v16 = vld [vmem:[%s330_s21] sm:$0xff]  ;;  %v345_v18 = vld [vmem:[%s1119_s3 + $0x8] sm:$0xff]  ;;  %v440_v21 = vld [vmem:[%s1121_s5 + $0x10] sm:$0xff]  ;;  %s657_s21 = sshll.u32 %s321_s20, 3  ;;  %s555_s15 = scalar_lea.hbm %s1123_s7, %s666_s22 }
  0x1a   : > { %696 = vmatpush3.msra.mxu0 %v357_v3  ;;  %v342_v17 = vld [vmem:[%s337_s8] sm:$0xff]  ;;  %729 = vmatpush3.msra.mxu1 %v440_v21  ;;  %v439_v22 = vld [vmem:[%s1121_s5 + $0x8] sm:$0xff]  ;;  %s323_s23 = scalar_lea.vmem [#allocation2], %s657_s21 }
  0x1b   : > { %697 = vmatprep.subr.mxu0 %v876_v1  ;;  %v344_v19 = vld [vmem:[%s1119_s3] sm:$0xff]  ;;  %v343_v20 = vadd.f32 %v342_v17, %v341_v16  ;;  %730 = vmatprep.subr.mxu1 %v876_v1  ;;  %v537_v38 = vsub.f32 %v341_v16, %v342_v17  ;;  %s557_s30 = sshll.u32 %s323_s23, 4  ;;  %s558_s30 = int_to_ptr.vmem [resolvable:$true] %s557_s30 }
  0x1c   : > { %698 = vmatpush3.msra.mxu0 %v356_v4  ;;  %731 = vmatpush3.msra.mxu1 %v439_v22  ;;  %v438_v23 = vld [vmem:[%s1121_s5] sm:$0xff]  ;;  %s798_s17 = scalar_lea.vmem %s558_s30, 128 }
  0x1d   : > { %699 = vmatprep.subr.mxu0 %v876_v1  ;;  %732 = vmatprep.subr.mxu1 %v876_v1  ;;  %v660_v24 = vld [vmem:[%s1120_s4] ss:$0 sm:$0xff]  ;;  %p799_p12 = scmp.ne.s32.totalorder %s558_s30, %s798_s17 }
  0x1e   : > { %700 = vmatpush3.msra.mxu0 %v355_v6  ;;  %733 = vmatpush3.msra.mxu1 %v438_v23  ;;  %v661_v29 = vld [vmem:[%s1122_s6] ss:$0 sm:$0xff] }
  0x1f   : > { %701 = vmatprep.subr.mxu0 %v876_v1  ;;  %v663_v31 = vld [vmem:[%s340_s12] ss:$0 sm:$0xff]  ;;  %p800_p13 = pnand %p799_p12, %p959_p4  ;;  %s878_s12 = smov [#allocation2]  }
  0x20   : > { %702 = vmatpush3.msra.mxu0 %v354_v7  ;;  %s802_s18 = sshll.u32 %s878_s12, 4  ;;  %s803_s18 = int_to_ptr.vmem [resolvable:$false] %s802_s18 }
  0x21   : > { %703 = vmatprep.subr.mxu0 %v876_v1  ;;  %p801_p0 = pneg %p800_p13  ;;  %s804_s27 = scalar_lea.vmem %s803_s18, 256 }
  0x22   : > { %704 = vmatpush3.msra.mxu0 %v353_v8  ;;  %p805_p1 = scmp.lt.s32.totalorder %s558_s30, %s803_s18  ;;  %p806_p2 = scmp.lt.s32.totalorder %s804_s27, %s798_s17 }
  0x23   : > { %705 = vmatprep.subr.mxu0 %v876_v1 }
  0x24   : > { %706 = vmatpush3.msra.mxu0 %v352_v9  ;;  %p807_p3 = por %p806_p2, %p805_p1 }
  0x25   : > { %707 = vmatprep.subr.mxu0 %v876_v1 }
  0x26   : > { %708 = vmatpush3.msra.mxu0 %v351_v10  ;;  %p808_p5 = pnand %p807_p3, %p801_p0 }
  0x27   : > { %709 = vmatprep.subr.mxu0 %v876_v1 }
  0x28   : > { %710 = vmatpush3.msra.mxu0 %v350_v11 }
  0x29   : > { %711 = vmatprep.subr.mxu0 %v876_v1 }
  0x2a   : > { %712 = vmatpush3.msra.mxu0 %v349_v12 }
  0x2b   : > { %713 = vmatprep.subr.mxu0 %v876_v1 }
  0x2c   : > { %714 = vmatpush3.msra.mxu0 %v348_v13 }
  0x2d   : > { %715 = vmatprep.subr.mxu0 %v876_v1 }
  0x2e   : > { %716 = vmatpush3.msra.mxu0 %v347_v14 }
  0x2f   : > { %717 = vmatprep.subr.mxu0 %v876_v1 }
  0x30   : > { %718 = vmatpush3.msra.mxu0 %v346_v15 }
  0x31   : > { %719 = vmatprep.subr.mxu0 %v876_v1 }
  0x32   : > { %720 = vmatpush3.msra.mxu0 %v345_v18 }
  0x33   : > { %721 = vmatprep.subr.mxu0 %v876_v1 }
  0x34   : > { %722 = vmatpush3.msra.mxu0 %v344_v19 }
  0x35   : > { %724 = vmatmul.mubr.f32.vlgmr.msra.gmra.mxu0 %v343_v20 }
  0xf5   : > { %v433_v25 = vpop.f32.mrf.mxu0 }
  0xf6   : > { %v434_v26 = vadd.f32 %v660_v24, %v433_v25 }
  0xf7   : > { %v725_v27 = vpop.f32.mrf.mxu0 }
  0xf8   : > { %v437_v28 = vmax.f32 %v434_v26, 0.0 }
  0xfa   : > { %735 = vmatmul.mubr.msk.f32.vlgmr.msra.gmra.mxu1 %vm449_vm1, %v437_v28 }
 0x1ba   : > { %v519_v30 = vpop.f32.mrf.mxu1 }
 0x1bb   : > { %v520_v32 = vadd.f32 %v661_v29, %v519_v30 }
 0x1bc   : > { %v736_v33 = vpop.f32.mrf.mxu1 }
 0x1bd   : > { %v530_v34 = vadd.f32 %v663_v31, %v520_v32 }
 0x1bf   : > { %v664_v35 = vmul.f32 -1.442695, %v530_v34 }
 0x1c1   : > { %794 = vpow2.f32 %v664_v35 }
 0x1ce   : > { %v795_v36 = vpop.eup %794 }
 0x1cf   : > { %v534_v37 = vadd.f32 1.0, %v795_v36 }
 0x1d1   : > { %796 = vrcp.f32 %v534_v37 }
 0x1de   : > { %v797_v39 = vpop.eup %796 }
 0x1df   : > { %v538_v40 = vmul.f32 %v797_v39, %v537_v38 }
 0x1e1   : > { %v539_v41 = vadd.f32 %v538_v40, %v342_v17 }
 0x1e3   : > { %v540_v42 = vmul.f32 2.0, %v539_v41 }
 0x1e5   : > { %541 = vst [vmem:[%s323_s23] sm:$0xff] %v540_v42 }
 0x1e6   : > { %811 = shalt.err (!%p808_p5)
}
 0x1e7   : > { %s812_s19 = scalar_lea.hbm %s555_s15, 128  ;;  %s816_s22 = scalar_lea.hbm %s1123_s7, 256 }
 0x1e8   : > { %p813_p6 = scmp.ne.s32.totalorder %s555_s15, %s812_s19  ;;  %p817_p10 = scmp.lt.s32.totalorder %s555_s15, %s1123_s7 }
 0x1e9   : > { %p818_p11 = scmp.lt.s32.totalorder %s816_s22, %s812_s19 }
 0x1ea   : > { %p814_p7 = pnand %p813_p6, %p959_p4 }
 0x1eb   : > { %p819_p12 = por %p818_p11, %p817_p10 }
 0x1ec   : > { %p815_p9 = pneg %p814_p7 }
 0x1ee   : > { %p820_p13 = pnand %p819_p12, %p815_p9 }
 0x1f0   : > { %823 = shalt.err (!%p820_p13)
}
 0x1f1   : > { %737 = dma.vmem_to_hbm [thread:$0]  (%p959_p4), %s558_s30, 128, %s555_s15, %s543_s16  }
 0x1f2 PF: > { %p743_p0 = scmp.ge.s32.totalorder %s874_s29, 2  ;;  %s569_s10 = sand.u32 1, %s854_s24  }
 0x1f3   : > { %s570_s17 = scalar_lea.sflag [#allocation3], %s569_s10 }
 0x1f4   : > { %p740_p1 = pnand %p743_p0, %p966_p8 }
 0x1f6   : > { %p741_p2 = pneg %p740_p1 }
 0x1f8   : > { %849 = dma.done.wait (%p741_p2), %s570_s17, 128  }
 0x1f9   : > { %851 = vsyncadd (%p741_p2), %s570_s17, 4294967168  ;;  %s20_s29 = sadd.s32 1, %s874_s29   ;;  %s1126_s24 = smov %s858_s25 }
 0x1fa   : > { %p17_p3 = scmp.ge.s32.totalorder %s20_s29, 4   ;;  %s1127_s25 = smov %s862_s26 }
 0x1fb   : > { %s1128_s26 = smov %s972_s14  ;;  %s1129_s27 = smov %s870_s28 }
 0x1fc   : > { %s1130_s28 = smov %s1132_s9  ;;  %19 = sbr.rel (!%p17_p3) target bundleno = 4 (0x4), region = 89 }
 0x201   :  { %575 = vsyncpa [#allocation3], 1 }
 0x202   :  { %577 = vsyncpa [#allocation3 + $0x1], 1 }

</bundles_post_ra>
